<compile_context>
chip_gen: v5e
topology: v5e:2x2
jax: 0.10.0
libtpu: 0.0.40
codegen_flags: <defaults>
</compile_context>

<pallas_src>
import jax
import jax.numpy as jnp
from jax.experimental import pallas as pl
from jax.experimental.pallas import tpu as pltpu

BN_EPS = 1e-5


# ---------------------------------------------------------------------------
# Kernel
# ---------------------------------------------------------------------------
def discriminator_kernel(x_ref, w_ref, v_ref, out_ref):
    """One independent group (one forward() call) per grid step.

    x_ref   : (B, 2E)        f32  input rows
    w_ref   : (4, HP, HP)    f32  packed, pre-transposed, zero-padded weights
    v_ref   : (16, HP)       f32  packed rows:
                               rows 0..3  -> biases b1..b4
                               row  4     -> b5 broadcast across all lanes
                               rows 5..8  -> gammas g1..g4
                               rows 9..12 -> betas  be1..be4
                               row  13    -> w5 as a (1, HP) row
    out_ref : (B, HP)        f32  lane-dense output slab (col 0 = sigmoid(logit))
    """
    B = x_ref.shape[0]
    inv_b = 1.0 / float(B)

    h = x_ref[...].astype(jnp.float32)          # (B, 2E)

    # Four Linear -> folded-BN -> ReLU layers (unrolled; all at HP=128 lanes).
    for i in range(4):
        din = h.shape[1]
        w = w_ref[i, :din, :]                   # static sub-tile slice (din, HP)
        b = v_ref[i:i + 1, :]                   # (1, HP)
        g = v_ref[5 + i:6 + i, :]               # (1, HP)
        be = v_ref[9 + i:10 + i, :]             # (1, HP)

        z = jnp.dot(h, w, preferred_element_type=jnp.float32) + b   # (B, HP)

        # Two independent single-pass sublane reductions.
        mu = jnp.sum(z, axis=0, keepdims=True) * inv_b               # (1, HP)
        ex2 = jnp.sum(z * z, axis=0, keepdims=True) * inv_b          # (1, HP)
        var = ex2 - mu * mu                                          # biased var

        scale = g * jax.lax.rsqrt(var + BN_EPS)                      # (1, HP)
        shift = be - mu * scale                                      # (1, HP)
        h = jnp.maximum(z * scale + shift, 0.0)                      # (B, HP)
        # Padded lanes: w/bias/gamma/beta are zero -> z=0, scale=0, shift=0,
        # so padded columns stay exactly 0 through every layer.

    # Final Linear(.., 1): VPU multiply + lane reduction instead of N=1 matmul.
    w5_row = v_ref[13:14, :]                                         # (1, HP)
    b5_row = v_ref[4:5, :]                                           # (1, HP)
    logits = jnp.sum(h * w5_row, axis=-1, keepdims=True)             # (B, 1)

    # Lane-dense store: broadcast the scalar logit across all 128 lanes.
    out_ref[...] = jax.nn.sigmoid(logits + b5_row).astype(out_ref.dtype)


# ---------------------------------------------------------------------------
# Parameter init (PyTorch-style shapes) and one-time packing
# ---------------------------------------------------------------------------
def _layer_dims(encoding_length):
    E = encoding_length
    return [2 * E, 4 * E, 2 * E, E, E // 2, 1]


def _padded_width(encoding_length):
    return max(128, -(-4 * encoding_length // 128) * 128)


def init_params(key, encoding_length):
    """Deterministic parameter init mirroring the PyTorch layer shapes."""
    dims = _layer_dims(encoding_length)
    params = {}
    keys = jax.random.split(key, len(dims) - 1)
    for i, (din, dout) in enumerate(zip(dims[:-1], dims[1:]), start=1):
        bound = 1.0 / jnp.sqrt(float(din))
        kw, kb = jax.random.split(keys[i - 1])
        # PyTorch Linear stores weight as (out, in).
        params[f"w{i}"] = jax.random.uniform(kw, (dout, din), jnp.float32, -bound, bound)
        params[f"b{i}"] = jax.random.uniform(kb, (dout,), jnp.float32, -bound, bound)
        if i <= 4:  # BatchNorm1d after the first four linears
            params[f"g{i}"] = jnp.ones((dout,), jnp.float32)
            params[f"be{i}"] = jnp.zeros((dout,), jnp.float32)
    return params


def pack_params(params, encoding_length):
    """Transpose + zero-pad + pack ALL parameters into two operands (done once,
    outside the jitted forward)."""
    HP = _padded_width(encoding_length)

    w_pack = jnp.zeros((4, HP, HP), jnp.float32)
    for i in range(4):
        wt = params[f"w{i + 1}"].T                       # (in, out)
        w_pack = w_pack.at[i, :wt.shape[0], :wt.shape[1]].set(wt)

    vec_pack = jnp.zeros((16, HP), jnp.float32)
    for i in range(4):
        b = params[f"b{i + 1}"]
        g = params[f"g{i + 1}"]
        be = params[f"be{i + 1}"]
        vec_pack = vec_pack.at[i, :b.shape[0]].set(b)
        vec_pack = vec_pack.at[5 + i, :g.shape[0]].set(g)
        vec_pack = vec_pack.at[9 + i, :be.shape[0]].set(be)
    # b5 broadcast across every lane so the lane-dense output slab is uniform.
    vec_pack = vec_pack.at[4, :].set(params["b5"][0])
    # w5 as a row (in-features along lanes) for the VPU reduction head.
    w5 = params["w5"][0]                                 # (in5,)
    vec_pack = vec_pack.at[13, :w5.shape[0]].set(w5)
    return w_pack, vec_pack


# ---------------------------------------------------------------------------
# Jitted forward (grouped) + single-batch convenience wrapper
# ---------------------------------------------------------------------------
@jax.jit
def discriminator_forward_groups(xg, w_pack, vec_pack):
    """xg: (G, B, 2E) -> (G, B, 1). Each group is an independent forward()
    call; BatchNorm statistics are computed per group."""
    G, B, Din = xg.shape
    HP = w_pack.shape[-1]

    # Advisory cost so XLA does not over-serialize around a ~microsecond call.
    matmul_flops = 2 * B * (Din * HP + 3 * HP * HP)
    bn_flops = 4 * (8 * B * HP + 6 * HP)
    head_flops = 3 * B * HP
    cost = pl.CostEstimate(
        flops=int(G * (matmul_flops + bn_flops + head_flops)),
        transcendentals=int(G * (4 * HP + B * HP)),
        bytes_accessed=int(G * (B * Din + B * HP) * 4
                           + w_pack.size * 4 + vec_pack.size * 4),
    )

    out = pl.pallas_call(
        discriminator_kernel,
        grid=(G,),
        in_specs=[
            pl.BlockSpec((None, B, Din), lambda g: (g, 0, 0)),   # per-group rows
            pl.BlockSpec((4, HP, HP), lambda g: (0, 0, 0)),      # weights (resident)
            pl.BlockSpec((16, HP), lambda g: (0, 0)),            # packed rows
        ],
        out_specs=pl.BlockSpec((None, B, HP), lambda g: (g, 0, 0)),
        out_shape=jax.ShapeDtypeStruct((G, B, HP), jnp.float32),
        compiler_params=pltpu.CompilerParams(
            dimension_semantics=("parallel",)),   # v7x: split groups across TCs
        cost_estimate=cost,
    )(xg, w_pack, vec_pack)

    return out[..., :1]                                          # (G, B, 1)


def discriminator_forward(x, w_pack, vec_pack):
    """x: (B, 2E) -> (B, 1). BN stats over the full batch, matching the module."""
    return discriminator_forward_groups(x[None], w_pack, vec_pack)[0]


# ---------------------------------------------------------------------------
# Pure-JAX reference (centered-variance BN) for validation
# ---------------------------------------------------------------------------
def _reference(x, params):
    h = x.astype(jnp.float32)
    for i in range(1, 5):
        h = h @ params[f"w{i}"].T + params[f"b{i}"]
        mu = jnp.mean(h, axis=0, keepdims=True)
        var = jnp.mean((h - mu) ** 2, axis=0, keepdims=True)
        h = params[f"g{i}"] * (h - mu) / jnp.sqrt(var + BN_EPS) + params[f"be{i}"]
        h = jnp.maximum(h, 0.0)
    h = h @ params["w5"].T + params["b5"]
    return jax.nn.sigmoid(h)


if __name__ == "__main__":
    encoding_length = 32          # E; input feature dim is 2*E = 64
    batch = 8

    key = jax.random.PRNGKey(0)
    k_params, k_x, k_groups = jax.random.split(key, 3)
    params = init_params(k_params, encoding_length)
    w_pack, vec_pack = pack_params(params, encoding_length)   # packed ONCE

    # Single forward (module semantics: BN over the whole batch).
    x = jax.random.normal(k_x, (batch, 2 * encoding_length), jnp.float32)
    out = jax.block_until_ready(discriminator_forward(x, w_pack, vec_pack))
    ref = _reference(x, params)
    assert out.shape == (batch, 1)
    assert jnp.allclose(out, ref, atol=2e-5, rtol=2e-5), "mismatch vs reference"

    # Grouped throughput path: several independent batches in one launch.
    G = 4
    xg = jax.random.normal(k_groups, (G, batch, 2 * encoding_length), jnp.float32)
    outg = jax.block_until_ready(discriminator_forward_groups(xg, w_pack, vec_pack))
    assert outg.shape == (G, batch, 1)
    for g in range(G):
        refg = _reference(xg[g], params)
        assert jnp.allclose(outg[g], refg, atol=2e-5, rtol=2e-5), f"group {g} mismatch"

    print("KERNEL_OK")
</pallas_src>

<mosaic_0001>
module attributes {stable_mosaic.version = 11 : i64} {
  func.func @discriminator_kernel(%arg0: i32, %arg1: memref<1x8x64xf32, #tpu.memory_space<vmem>>, %arg2: memref<4x128x128xf32, #tpu.memory_space<vmem>>, %arg3: memref<16x128xf32, #tpu.memory_space<vmem>>, %arg4: memref<1x8x128xf32, #tpu.memory_space<vmem>>) attributes {dimension_semantics = [#tpu.dimension_semantics<parallel>], iteration_bounds = array<i64: 1>, scalar_prefetch = 0 : i64, scratch_operands = 0 : i64, tpu.core_type = #tpu.core_type<tc>, window_params = [{transform_indices = @transform_0, window_bounds = array<i64: 1, 8, 64>}, {pipeline_mode = #tpu.pipeline_mode<synchronous>, transform_indices = @transform_1, window_bounds = array<i64: 4, 128, 128>}, {pipeline_mode = #tpu.pipeline_mode<synchronous>, transform_indices = @transform_2, window_bounds = array<i64: 16, 128>}, {transform_indices = @transform_3, window_bounds = array<i64: 1, 8, 128>}]} {
    %c0 = arith.constant 0 : index
    %c0_0 = arith.constant 0 : index
    %c0_1 = arith.constant 0 : index
    %0 = vector.load %arg1[%c0, %c0_0, %c0_1] : memref<1x8x64xf32, #tpu.memory_space<vmem>>, vector<1x8x64xf32>
    %1 = vector.shape_cast %0 : vector<1x8x64xf32> to vector<8x64xf32>
    %c0_2 = arith.constant 0 : index
    %c0_3 = arith.constant 0 : index
    %c0_4 = arith.constant 0 : index
    %2 = vector.load %arg2[%c0_2, %c0_3, %c0_4] : memref<4x128x128xf32, #tpu.memory_space<vmem>>, vector<1x64x128xf32>
    %3 = vector.shape_cast %2 : vector<1x64x128xf32> to vector<64x128xf32>
    %c0_5 = arith.constant 0 : index
    %c0_6 = arith.constant 0 : index
    %4 = vector.load %arg3[%c0_5, %c0_6] : memref<16x128xf32, #tpu.memory_space<vmem>>, vector<1x128xf32>
    %c5 = arith.constant 5 : index
    %c0_7 = arith.constant 0 : index
    %5 = vector.load %arg3[%c5, %c0_7] : memref<16x128xf32, #tpu.memory_space<vmem>>, vector<1x128xf32>
    %c9 = arith.constant 9 : index
    %c0_8 = arith.constant 0 : index
    %6 = vector.load %arg3[%c9, %c0_8] : memref<16x128xf32, #tpu.memory_space<vmem>>, vector<1x128xf32>
    %cst = arith.constant dense<0.000000e+00> : vector<8x128xf32>
    %7 = tpu.matmul %1, %3, %cst {dimension_numbers = #tpu.dot_dimension_numbers<[1], [0], [0], [1], [0, 0, 1, 1], [], []>} : vector<8x64xf32>, vector<64x128xf32>, vector<8x128xf32> -> vector<8x128xf32>
    %8 = vector.broadcast %4 : vector<1x128xf32> to vector<8x128xf32>
    %9 = arith.addf %7, %8 : vector<8x128xf32>
    %cst_9 = arith.constant dense<0.000000e+00> : vector<128xf32>
    %10 = vector.multi_reduction <add>, %9, %cst_9 [0] : vector<8x128xf32> to vector<128xf32>
    %11 = vector.shape_cast %10 : vector<128xf32> to vector<1x128xf32>
    %cst_10 = arith.constant 1.250000e-01 : f32
    %12 = vector.broadcast %cst_10 : f32 to vector<1x128xf32>
    %13 = arith.mulf %11, %12 : vector<1x128xf32>
    %14 = arith.mulf %9, %9 : vector<8x128xf32>
    %cst_11 = arith.constant dense<0.000000e+00> : vector<128xf32>
    %15 = vector.multi_reduction <add>, %14, %cst_11 [0] : vector<8x128xf32> to vector<128xf32>
    %16 = vector.shape_cast %15 : vector<128xf32> to vector<1x128xf32>
    %cst_12 = arith.constant 1.250000e-01 : f32
    %17 = vector.broadcast %cst_12 : f32 to vector<1x128xf32>
    %18 = arith.mulf %16, %17 : vector<1x128xf32>
    %19 = arith.mulf %13, %13 : vector<1x128xf32>
    %20 = arith.subf %18, %19 : vector<1x128xf32>
    %cst_13 = arith.constant 9.99999974E-6 : f32
    %21 = vector.broadcast %cst_13 : f32 to vector<1x128xf32>
    %22 = arith.addf %20, %21 : vector<1x128xf32>
    %23 = math.rsqrt %22 : vector<1x128xf32>
    %24 = arith.mulf %5, %23 : vector<1x128xf32>
    %25 = arith.mulf %13, %24 : vector<1x128xf32>
    %26 = arith.subf %6, %25 : vector<1x128xf32>
    %27 = vector.broadcast %24 : vector<1x128xf32> to vector<8x128xf32>
    %28 = arith.mulf %9, %27 : vector<8x128xf32>
    %29 = vector.broadcast %26 : vector<1x128xf32> to vector<8x128xf32>
    %30 = arith.addf %28, %29 : vector<8x128xf32>
    %cst_14 = arith.constant 0.000000e+00 : f32
    %31 = vector.broadcast %cst_14 : f32 to vector<8x128xf32>
    %32 = arith.maximumf %30, %31 : vector<8x128xf32>
    %c1 = arith.constant 1 : index
    %c0_15 = arith.constant 0 : index
    %c0_16 = arith.constant 0 : index
    %33 = vector.load %arg2[%c1, %c0_15, %c0_16] : memref<4x128x128xf32, #tpu.memory_space<vmem>>, vector<1x128x128xf32>
    %34 = vector.shape_cast %33 : vector<1x128x128xf32> to vector<128x128xf32>
    %c1_17 = arith.constant 1 : index
    %c0_18 = arith.constant 0 : index
    %35 = vector.load %arg3[%c1_17, %c0_18] : memref<16x128xf32, #tpu.memory_space<vmem>>, vector<1x128xf32>
    %c6 = arith.constant 6 : index
    %c0_19 = arith.constant 0 : index
    %36 = vector.load %arg3[%c6, %c0_19] : memref<16x128xf32, #tpu.memory_space<vmem>>, vector<1x128xf32>
    %c10 = arith.constant 10 : index
    %c0_20 = arith.constant 0 : index
    %37 = vector.load %arg3[%c10, %c0_20] : memref<16x128xf32, #tpu.memory_space<vmem>>, vector<1x128xf32>
    %cst_21 = arith.constant dense<0.000000e+00> : vector<8x128xf32>
    %38 = tpu.matmul %32, %34, %cst_21 {dimension_numbers = #tpu.dot_dimension_numbers<[1], [0], [0], [1], [0, 0, 1, 1], [], []>} : vector<8x128xf32>, vector<128x128xf32>, vector<8x128xf32> -> vector<8x128xf32>
    %39 = vector.broadcast %35 : vector<1x128xf32> to vector<8x128xf32>
    %40 = arith.addf %38, %39 : vector<8x128xf32>
    %cst_22 = arith.constant dense<0.000000e+00> : vector<128xf32>
    %41 = vector.multi_reduction <add>, %40, %cst_22 [0] : vector<8x128xf32> to vector<128xf32>
    %42 = vector.shape_cast %41 : vector<128xf32> to vector<1x128xf32>
    %cst_23 = arith.constant 1.250000e-01 : f32
    %43 = vector.broadcast %cst_23 : f32 to vector<1x128xf32>
    %44 = arith.mulf %42, %43 : vector<1x128xf32>
    %45 = arith.mulf %40, %40 : vector<8x128xf32>
    %cst_24 = arith.constant dense<0.000000e+00> : vector<128xf32>
    %46 = vector.multi_reduction <add>, %45, %cst_24 [0] : vector<8x128xf32> to vector<128xf32>
    %47 = vector.shape_cast %46 : vector<128xf32> to vector<1x128xf32>
    %cst_25 = arith.constant 1.250000e-01 : f32
    %48 = vector.broadcast %cst_25 : f32 to vector<1x128xf32>
    %49 = arith.mulf %47, %48 : vector<1x128xf32>
    %50 = arith.mulf %44, %44 : vector<1x128xf32>
    %51 = arith.subf %49, %50 : vector<1x128xf32>
    %cst_26 = arith.constant 9.99999974E-6 : f32
    %52 = vector.broadcast %cst_26 : f32 to vector<1x128xf32>
    %53 = arith.addf %51, %52 : vector<1x128xf32>
    %54 = math.rsqrt %53 : vector<1x128xf32>
    %55 = arith.mulf %36, %54 : vector<1x128xf32>
    %56 = arith.mulf %44, %55 : vector<1x128xf32>
    %57 = arith.subf %37, %56 : vector<1x128xf32>
    %58 = vector.broadcast %55 : vector<1x128xf32> to vector<8x128xf32>
    %59 = arith.mulf %40, %58 : vector<8x128xf32>
    %60 = vector.broadcast %57 : vector<1x128xf32> to vector<8x128xf32>
    %61 = arith.addf %59, %60 : vector<8x128xf32>
    %cst_27 = arith.constant 0.000000e+00 : f32
    %62 = vector.broadcast %cst_27 : f32 to vector<8x128xf32>
    %63 = arith.maximumf %61, %62 : vector<8x128xf32>
    %c2 = arith.constant 2 : index
    %c0_28 = arith.constant 0 : index
    %c0_29 = arith.constant 0 : index
    %64 = vector.load %arg2[%c2, %c0_28, %c0_29] : memref<4x128x128xf32, #tpu.memory_space<vmem>>, vector<1x128x128xf32>
    %65 = vector.shape_cast %64 : vector<1x128x128xf32> to vector<128x128xf32>
    %c2_30 = arith.constant 2 : index
    %c0_31 = arith.constant 0 : index
    %66 = vector.load %arg3[%c2_30, %c0_31] : memref<16x128xf32, #tpu.memory_space<vmem>>, vector<1x128xf32>
    %c7 = arith.constant 7 : index
    %c0_32 = arith.constant 0 : index
    %67 = vector.load %arg3[%c7, %c0_32] : memref<16x128xf32, #tpu.memory_space<vmem>>, vector<1x128xf32>
    %c11 = arith.constant 11 : index
    %c0_33 = arith.constant 0 : index
    %68 = vector.load %arg3[%c11, %c0_33] : memref<16x128xf32, #tpu.memory_space<vmem>>, vector<1x128xf32>
    %cst_34 = arith.constant dense<0.000000e+00> : vector<8x128xf32>
    %69 = tpu.matmul %63, %65, %cst_34 {dimension_numbers = #tpu.dot_dimension_numbers<[1], [0], [0], [1], [0, 0, 1, 1], [], []>} : vector<8x128xf32>, vector<128x128xf32>, vector<8x128xf32> -> vector<8x128xf32>
    %70 = vector.broadcast %66 : vector<1x128xf32> to vector<8x128xf32>
    %71 = arith.addf %69, %70 : vector<8x128xf32>
    %cst_35 = arith.constant dense<0.000000e+00> : vector<128xf32>
    %72 = vector.multi_reduction <add>, %71, %cst_35 [0] : vector<8x128xf32> to vector<128xf32>
    %73 = vector.shape_cast %72 : vector<128xf32> to vector<1x128xf32>
    %cst_36 = arith.constant 1.250000e-01 : f32
    %74 = vector.broadcast %cst_36 : f32 to vector<1x128xf32>
    %75 = arith.mulf %73, %74 : vector<1x128xf32>
    %76 = arith.mulf %71, %71 : vector<8x128xf32>
    %cst_37 = arith.constant dense<0.000000e+00> : vector<128xf32>
    %77 = vector.multi_reduction <add>, %76, %cst_37 [0] : vector<8x128xf32> to vector<128xf32>
    %78 = vector.shape_cast %77 : vector<128xf32> to vector<1x128xf32>
    %cst_38 = arith.constant 1.250000e-01 : f32
    %79 = vector.broadcast %cst_38 : f32 to vector<1x128xf32>
    %80 = arith.mulf %78, %79 : vector<1x128xf32>
    %81 = arith.mulf %75, %75 : vector<1x128xf32>
    %82 = arith.subf %80, %81 : vector<1x128xf32>
    %cst_39 = arith.constant 9.99999974E-6 : f32
    %83 = vector.broadcast %cst_39 : f32 to vector<1x128xf32>
    %84 = arith.addf %82, %83 : vector<1x128xf32>
    %85 = math.rsqrt %84 : vector<1x128xf32>
    %86 = arith.mulf %67, %85 : vector<1x128xf32>
    %87 = arith.mulf %75, %86 : vector<1x128xf32>
    %88 = arith.subf %68, %87 : vector<1x128xf32>
    %89 = vector.broadcast %86 : vector<1x128xf32> to vector<8x128xf32>
    %90 = arith.mulf %71, %89 : vector<8x128xf32>
    %91 = vector.broadcast %88 : vector<1x128xf32> to vector<8x128xf32>
    %92 = arith.addf %90, %91 : vector<8x128xf32>
    %cst_40 = arith.constant 0.000000e+00 : f32
    %93 = vector.broadcast %cst_40 : f32 to vector<8x128xf32>
    %94 = arith.maximumf %92, %93 : vector<8x128xf32>
    %c3 = arith.constant 3 : index
    %c0_41 = arith.constant 0 : index
    %c0_42 = arith.constant 0 : index
    %95 = vector.load %arg2[%c3, %c0_41, %c0_42] : memref<4x128x128xf32, #tpu.memory_space<vmem>>, vector<1x128x128xf32>
    %96 = vector.shape_cast %95 : vector<1x128x128xf32> to vector<128x128xf32>
    %c3_43 = arith.constant 3 : index
    %c0_44 = arith.constant 0 : index
    %97 = vector.load %arg3[%c3_43, %c0_44] : memref<16x128xf32, #tpu.memory_space<vmem>>, vector<1x128xf32>
    %c8 = arith.constant 8 : index
    %c0_45 = arith.constant 0 : index
    %98 = vector.load %arg3[%c8, %c0_45] : memref<16x128xf32, #tpu.memory_space<vmem>>, vector<1x128xf32>
    %c12 = arith.constant 12 : index
    %c0_46 = arith.constant 0 : index
    %99 = vector.load %arg3[%c12, %c0_46] : memref<16x128xf32, #tpu.memory_space<vmem>>, vector<1x128xf32>
    %cst_47 = arith.constant dense<0.000000e+00> : vector<8x128xf32>
    %100 = tpu.matmul %94, %96, %cst_47 {dimension_numbers = #tpu.dot_dimension_numbers<[1], [0], [0], [1], [0, 0, 1, 1], [], []>} : vector<8x128xf32>, vector<128x128xf32>, vector<8x128xf32> -> vector<8x128xf32>
    %101 = vector.broadcast %97 : vector<1x128xf32> to vector<8x128xf32>
    %102 = arith.addf %100, %101 : vector<8x128xf32>
    %cst_48 = arith.constant dense<0.000000e+00> : vector<128xf32>
    %103 = vector.multi_reduction <add>, %102, %cst_48 [0] : vector<8x128xf32> to vector<128xf32>
    %104 = vector.shape_cast %103 : vector<128xf32> to vector<1x128xf32>
    %cst_49 = arith.constant 1.250000e-01 : f32
    %105 = vector.broadcast %cst_49 : f32 to vector<1x128xf32>
    %106 = arith.mulf %104, %105 : vector<1x128xf32>
    %107 = arith.mulf %102, %102 : vector<8x128xf32>
    %cst_50 = arith.constant dense<0.000000e+00> : vector<128xf32>
    %108 = vector.multi_reduction <add>, %107, %cst_50 [0] : vector<8x128xf32> to vector<128xf32>
    %109 = vector.shape_cast %108 : vector<128xf32> to vector<1x128xf32>
    %cst_51 = arith.constant 1.250000e-01 : f32
    %110 = vector.broadcast %cst_51 : f32 to vector<1x128xf32>
    %111 = arith.mulf %109, %110 : vector<1x128xf32>
    %112 = arith.mulf %106, %106 : vector<1x128xf32>
    %113 = arith.subf %111, %112 : vector<1x128xf32>
    %cst_52 = arith.constant 9.99999974E-6 : f32
    %114 = vector.broadcast %cst_52 : f32 to vector<1x128xf32>
    %115 = arith.addf %113, %114 : vector<1x128xf32>
    %116 = math.rsqrt %115 : vector<1x128xf32>
    %117 = arith.mulf %98, %116 : vector<1x128xf32>
    %118 = arith.mulf %106, %117 : vector<1x128xf32>
    %119 = arith.subf %99, %118 : vector<1x128xf32>
    %120 = vector.broadcast %117 : vector<1x128xf32> to vector<8x128xf32>
    %121 = arith.mulf %102, %120 : vector<8x128xf32>
    %122 = vector.broadcast %119 : vector<1x128xf32> to vector<8x128xf32>
    %123 = arith.addf %121, %122 : vector<8x128xf32>
    %cst_53 = arith.constant 0.000000e+00 : f32
    %124 = vector.broadcast %cst_53 : f32 to vector<8x128xf32>
    %125 = arith.maximumf %123, %124 : vector<8x128xf32>
    %c13 = arith.constant 13 : index
    %c0_54 = arith.constant 0 : index
    %126 = vector.load %arg3[%c13, %c0_54] : memref<16x128xf32, #tpu.memory_space<vmem>>, vector<1x128xf32>
    %c4 = arith.constant 4 : index
    %c0_55 = arith.constant 0 : index
    %127 = vector.load %arg3[%c4, %c0_55] : memref<16x128xf32, #tpu.memory_space<vmem>>, vector<1x128xf32>
    %128 = vector.broadcast %126 : vector<1x128xf32> to vector<8x128xf32>
    %129 = arith.mulf %125, %128 : vector<8x128xf32>
    %cst_56 = arith.constant dense<0.000000e+00> : vector<8xf32>
    %130 = vector.multi_reduction <add>, %129, %cst_56 [1] : vector<8x128xf32> to vector<8xf32>
    %131 = vector.shape_cast %130 : vector<8xf32> to vector<8x1xf32>
    %132 = vector.broadcast %131 : vector<8x1xf32> to vector<8x128xf32>
    %133 = vector.broadcast %127 : vector<1x128xf32> to vector<8x128xf32>
    %134 = arith.addf %132, %133 : vector<8x128xf32>
    %135 = arith.negf %134 : vector<8x128xf32>
    %136 = math.exp %135 : vector<8x128xf32>
    %cst_57 = arith.constant 1.000000e+00 : f32
    %137 = vector.broadcast %cst_57 : f32 to vector<8x128xf32>
    %138 = arith.addf %137, %136 : vector<8x128xf32>
    %139 = arith.divf %137, %138 : vector<8x128xf32>
    %c0_58 = arith.constant 0 : index
    %c0_59 = arith.constant 0 : index
    %c0_60 = arith.constant 0 : index
    %140 = vector.load %arg4[%c0_58, %c0_59, %c0_60] : memref<1x8x128xf32, #tpu.memory_space<vmem>>, vector<1x8x128xf32>
    %141 = vector.shape_cast %140 : vector<1x8x128xf32> to vector<8x128xf32>
    %142 = vector.shape_cast %139 : vector<8x128xf32> to vector<1x8x128xf32>
    tpu.vector_store %arg4[%c0_58, %c0_59, %c0_60], %142 {strides = array<i32>} : memref<1x8x128xf32, #tpu.memory_space<vmem>>, vector<1x8x128xf32>,
    return
  }
  func.func @transform_0(%arg0: i32) -> (i32, i32, i32) {
    %c0_i32 = arith.constant 0 : i32
    %c0_i32_0 = arith.constant 0 : i32
    %c0_i32_1 = arith.constant 0 : i32
    return %arg0, %c0_i32, %c0_i32_0 : i32, i32, i32
  }
  func.func @transform_1(%arg0: i32) -> (i32, i32, i32) {
    %c0_i32 = arith.constant 0 : i32
    %c0_i32_0 = arith.constant 0 : i32
    %c0_i32_1 = arith.constant 0 : i32
    %c0_i32_2 = arith.constant 0 : i32
    return %c0_i32, %c0_i32_0, %c0_i32_1 : i32, i32, i32
  }
  func.func @transform_2(%arg0: i32) -> (i32, i32) {
    %c0_i32 = arith.constant 0 : i32
    %c0_i32_0 = arith.constant 0 : i32
    %c0_i32_1 = arith.constant 0 : i32
    return %c0_i32, %c0_i32_0 : i32, i32
  }
  func.func @transform_3(%arg0: i32) -> (i32, i32, i32) {
    %c0_i32 = arith.constant 0 : i32
    %c0_i32_0 = arith.constant 0 : i32
    %c0_i32_1 = arith.constant 0 : i32
    return %arg0, %c0_i32, %c0_i32_0 : i32, i32, i32
  }
}

</mosaic_0001>

<bundles_post_ra>
// kernel: discriminator_forward_groups.1
= control target key start
LH: loop header
LB: loop body
LE: loop exit
PB: predicated region body
PF: predicated region fallthrough
CT: control target
= control target key end

     0   :  { %8 = vsyncpa [#allocation3], 0  ;;  %s535_s0 = inlined_call_operand.hbm [shape: f32[1,8,64], index: 0, kind: input, shape index: {}]   ;;  %s536_s1 = inlined_call_operand.hbm [shape: f32[4,128,128], index: 1, kind: input, shape index: {}]   ;;  %s537_s2 = inlined_call_operand.hbm [shape: f32[16,128], index: 2, kind: input, shape index: {}]   ;;  %s538_s3 = inlined_call_operand.vmem [shape: f32[1,8,128], index: 3, kind: output, shape index: {}]  }
   0x1   :  { %9 = vsyncpa [#allocation5], 0  ;;  %s25_s14 = sshll.u32 %s536_s1, 4  ;;  %s498_s15 = smov [#allocation4]   ;;  %s26_s14 = int_to_ptr.hbm [resolvable:$true] %s25_s14 }
   0x2   :  { %s27_s16 = sshll.u32 %s498_s15, 4  ;;  %s15_s19 = sshll.u32 %s535_s0, 4  ;;  %s28_s16 = int_to_ptr.vmem [resolvable:$true] %s27_s16  ;;  %s16_s19 = int_to_ptr.hbm [resolvable:$true] %s15_s19 }
   0x3   :  { %s499_s20 = smov 128   ;;  %s500_s21 = smov 8  }
   0x4   :  { %33 = dma.hbm_to_vmem [thread:$0]  %s26_s14, 8192, %s28_s16, [#allocation5], %s499_s20, %s499_s20, %s500_s21  }
   0x5   :  { %s501_s22 = smov [#allocation2]   ;;  %s38_s26 = sshll.u32 %s537_s2, 4  ;;  %s39_s26 = int_to_ptr.hbm [resolvable:$true] %s38_s26 }
   0x6   :  { %s17_s23 = sshll.u32 %s501_s22, 4  ;;  %s502_s1 = smov [#allocation6]   ;;  %s18_s23 = int_to_ptr.vmem [resolvable:$true] %s17_s23 }
   0x7   :  { %20 = dma.hbm_to_vmem [thread:$0]  %s16_s19, 128, %s18_s23, [#allocation3]  }
   0x8   :  { %s40_s27 = sshll.u32 %s502_s1, 4  ;;  %s41_s27 = int_to_ptr.vmem [resolvable:$true] %s40_s27 }
   0x9   :  { %46 = dma.hbm_to_vmem [thread:$0]  %s39_s26, 256, %s41_s27, [#allocation5], %s499_s20, %s499_s20, %s500_s21  }
   0xa   :  { %494 = dma.done.wait [#allocation3], 128  }
   0xb   :  { %495 = vsyncadd [#allocation3], 4294967168 }
   0xc   :  { %496 = dma.done.wait [#allocation5], 8448  }
   0xd   :  { %497 = vsyncadd [#allocation5], 4294958848  ;;  %v67_v0 = vld [vmem:[#allocation4 + $0x38] sm:$0xff]  ;;  %v66_v1 = vld [vmem:[#allocation4 + $0x30] sm:$0xff]  ;;  %vm72_vm0 = vcmask 523264  }
   0xe   :  { %84 = vmatpush.msra.mxu0 %v67_v0  ;;  %v65_v2 = vld [vmem:[#allocation4 + $0x28] sm:$0xff]  ;;  %v64_v3 = vld [vmem:[#allocation4 + $0x20] sm:$0xff]  ;;  %v63_v4 = vld [vmem:[#allocation4 + $0x18] sm:$0xff] }
   0xf   :  { %v62_v5 = vld [vmem:[#allocation4 + $0x10] sm:$0xff]  ;;  %v61_v6 = vld [vmem:[#allocation4 + $0x8] sm:$0xff]  ;;  %v60_v7 = vld [vmem:[#allocation4] sm:$0xff] }
  0x10   :  { %85 = vmatpush.msra.mxu0 %v66_v1  ;;  %v59_v8 = vld [vmem:[#allocation2] sm:$0xff]  ;;  %v147_v10 = vld [vmem:[#allocation4 + $0xf0] sm:$0xff]  ;;  %v146_v11 = vld [vmem:[#allocation4 + $0xe8] sm:$0xff] }
  0x11   :  { %v148_v9 = vld [vmem:[#allocation4 + $0xf8] sm:$0xff]  ;;  %v145_v12 = vld [vmem:[#allocation4 + $0xe0] sm:$0xff]  ;;  %v143_v14 = vld [vmem:[#allocation4 + $0xd0] sm:$0xff] }
  0x12   :  { %86 = vmatpush.msra.mxu0 %v65_v2  ;;  %153 = vmatpush.msra.mxu1 %v148_v9  ;;  %v144_v13 = vld [vmem:[#allocation4 + $0xd8] sm:$0xff]  ;;  %v142_v15 = vld [vmem:[#allocation4 + $0xc8] sm:$0xff]  ;;  %v141_v16 = vld [vmem:[#allocation4 + $0xc0] sm:$0xff] }
  0x13   :  { %v404_v17 = vld [vmem:[#allocation6] ss:$0 sm:$0xff]  ;;  %v140_v18 = vld [vmem:[#allocation4 + $0xb8] sm:$0xff]  ;;  %v139_v19 = vld [vmem:[#allocation4 + $0xb0] sm:$0xff] }
  0x14   :  { %87 = vmatpush.msra.mxu0 %v64_v3  ;;  %154 = vmatpush.msra.mxu1 %v147_v10  ;;  %v138_v22 = vld [vmem:[#allocation4 + $0xa8] sm:$0xff]  ;;  %v137_v25 = vld [vmem:[#allocation4 + $0xa0] sm:$0xff]  ;;  %v136_v28 = vld [vmem:[#allocation4 + $0x98] sm:$0xff] }
  0x15   :  { %v135_v31 = vld [vmem:[#allocation4 + $0x90] sm:$0xff]  ;;  %v134_v34 = vld [vmem:[#allocation4 + $0x88] sm:$0xff]  ;;  %v133_v36 = vld [vmem:[#allocation4 + $0x80] sm:$0xff] }
  0x16   :  { %88 = vmatpush.msra.mxu0 %v63_v4  ;;  %155 = vmatpush.msra.mxu1 %v146_v11  ;;  %v69_v51 = vld [vmem:[#allocation6 + $0x5] sm:$0x1]  ;;  %v70_v55 = vld [vmem:[#allocation6 + $0x9] sm:$0x1]  ;;  %v225_v63 = vld [vmem:[#allocation4 + $0x178] sm:$0xff] }
  0x17   :  { %v224_v0 = vld [vmem:[#allocation4 + $0x170] sm:$0xff]  ;;  %230 = vmatpush.msra.mxu2 %v225_v63  ;;  %v223_v1 = vld [vmem:[#allocation4 + $0x168] sm:$0xff]  ;;  %v222_v2 = vld [vmem:[#allocation4 + $0x160] sm:$0xff] }
  0x18   :  { %89 = vmatpush.msra.mxu0 %v62_v5  ;;  %156 = vmatpush.msra.mxu1 %v145_v12  ;;  %v221_v3 = vld [vmem:[#allocation4 + $0x158] sm:$0xff]  ;;  %v220_v4 = vld [vmem:[#allocation4 + $0x150] sm:$0xff]  ;;  %v219_v5 = vld [vmem:[#allocation4 + $0x148] sm:$0xff] }
  0x19   :  { %231 = vmatpush.msra.mxu2 %v224_v0  ;;  %v216_v9 = vld [vmem:[#allocation4 + $0x130] sm:$0xff]  ;;  %v215_v12 = vld [vmem:[#allocation4 + $0x128] sm:$0xff] }
  0x1a   :  { %90 = vmatpush.msra.mxu0 %v61_v6  ;;  %157 = vmatpush.msra.mxu1 %v144_v13  ;;  %v218_v6 = vld [vmem:[#allocation4 + $0x140] sm:$0xff]  ;;  %v293_v63 = vld [vmem:[#allocation4 + $0x1b0] sm:$0xff] }
  0x1b   :  { %232 = vmatpush.msra.mxu2 %v223_v1 }
  0x1c   :  { %91 = vmatpush.msra.mxu0 %v60_v7  ;;  %158 = vmatpush.msra.mxu1 %v143_v14  ;;  %v405_v7 = vld [vmem:[#allocation6 + $0x1] ss:$0 sm:$0xff] }
  0x1d   :  { %397 = vmatmul.msk.f32.vlgmr.msra.gmra.mxu0 %vm72_vm0, %v59_v8  ;;  %233 = vmatpush.msra.mxu2 %v222_v2  ;;  %v217_v8 = vld [vmem:[#allocation4 + $0x138] sm:$0xff]  ;;  %v292_v2 = vld [vmem:[#allocation4 + $0x1a8] sm:$0xff] }
  0x1e   :  { %159 = vmatpush.msra.mxu1 %v142_v15  ;;  %v214_v15 = vld [vmem:[#allocation4 + $0x120] sm:$0xff] }
  0x1f   :  { %234 = vmatpush.msra.mxu2 %v221_v3 }
  0x20   :  { %160 = vmatpush.msra.mxu1 %v141_v16 }
  0x21   :  { %235 = vmatpush.msra.mxu2 %v220_v4 }
  0x22   :  { %161 = vmatpush.msra.mxu1 %v140_v18  ;;  %v213_v18 = vld [vmem:[#allocation4 + $0x118] sm:$0xff] }
  0x23   :  { %236 = vmatpush.msra.mxu2 %v219_v5  ;;  %v291_v5 = vld [vmem:[#allocation4 + $0x1a0] sm:$0xff] }
  0x24   :  { %162 = vmatpush.msra.mxu1 %v139_v19 }
  0x25   :  { %237 = vmatpush.msra.mxu2 %v218_v6 }
  0x26   :  { %163 = vmatpush.msra.mxu1 %v138_v22 }
  0x27   :  { %238 = vmatpush.msra.mxu2 %v217_v8  ;;  %v290_v8 = vld [vmem:[#allocation4 + $0x198] sm:$0xff] }
  0x28   :  { %164 = vmatpush.msra.mxu1 %v137_v25 }
  0x29   :  { %239 = vmatpush.msra.mxu2 %v216_v9 }
  0x2a   :  { %165 = vmatpush.msra.mxu1 %v136_v28 }
  0x2b   :  { %240 = vmatpush.msra.mxu2 %v215_v12 }
  0x2c   :  { %166 = vmatpush.msra.mxu1 %v135_v31 }
  0x2d   :  { %241 = vmatpush.msra.mxu2 %v214_v15 }
  0x2e   :  { %167 = vmatpush.msra.mxu1 %v134_v34 }
  0x2f   :  { %242 = vmatpush.msra.mxu2 %v213_v18 }
  0x30   :  { %168 = vmatpush.msra.mxu1 %v133_v36 }
  0x9a   :  { %v93_v20 = vpop.f32.mrf.mxu0 }
  0x9b   :  { %v94_v21 = vadd.f32 %v404_v17, %v93_v20 }
  0x9d   :  { %v96_v23 = vrot.slane %v94_v21, 4  ;;  %v103_v24 = vmul.f32 %v94_v21, %v94_v21 }
  0x9f   :  { %v97_v26 = vadd.f32 %v96_v23, %v94_v21  ;;  %v104_v27 = vrot.slane %v103_v24, 4 }
  0xa1   :  { %v98_v29 = vrot.slane %v97_v26, 2  ;;  %v105_v30 = vadd.f32 %v104_v27, %v103_v24  ;;  %v211_v24 = vld [vmem:[#allocation4 + $0x108] sm:$0xff] }
  0xa3   :  { %v99_v32 = vadd.f32 %v98_v29, %v97_v26  ;;  %v106_v33 = vrot.slane %v105_v30, 2  ;;  %v210_v26 = vld [vmem:[#allocation4 + $0x100] sm:$0xff] }
  0xa5   :  { %v107_v35 = vadd.f32 %v106_v33, %v105_v30  ;;  %v100_v37 = vrot.slane %v99_v32, 1 }
  0xa7   :  { %v108_v38 = vrot.slane %v107_v35, 1  ;;  %v101_v39 = vadd.f32 %v100_v37, %v99_v32 }
  0xa9   :  { %v109_v40 = vadd.f32 %v108_v38, %v107_v35  ;;  %v102_v41 = vmul.f32 0.125, %v101_v39 }
  0xab   :  { %v110_v42 = vmul.f32 0.125, %v109_v40  ;;  %v111_v43 = vmul.f32 %v102_v41, %v102_v41 }
  0xad   :  { %v112_v44 = vsub.f32 %v110_v42, %v111_v43 }
  0xaf   :  { %v113_v45 = vadd.f32 1e-05, %v112_v44 }
  0xb1   :  { %410 = vrsqrt.f32 %v113_v45  ;;  %vm120_vm2 = vweird.f32 %v113_v45 }
  0xb7   :  { %v411_v46 = vpop.eup %410 }
  0xb8   :  { %v115_v47 = vmul.f32 %v411_v46, %v113_v45  ;;  %vm121_vm1 = vweird.f32 %v411_v46  ;;  %v151_v45 = vld [vmem:[#allocation6 + $0xa] sm:$0x1] }
  0xb9   :  { %vm122_vm3 = vmor %vm120_vm2, %vm121_vm1 }
  0xba   :  { %v116_v48 = vmul.f32 %v411_v46, %v115_v47 }
  0xbc   :  { %v117_v49 = vmul.f32 0.5, %v116_v48 }
  0xbe   :  { %v118_v50 = vsub.f32 1.5, %v117_v49 }
  0xc0   :  { %v119_v52 = vmul.f32 %v411_v46, %v118_v50 }
  0xc2   :  { %v123_v53 = vsel %vm122_vm3, %v411_v46, %v119_v52 }
  0xc3   :  { %v124_v54 = vmul.f32 %v123_v53, %v69_v51  ;;  %v302_v53 = vld [vmem:[#allocation4 + $0x1f8] sm:$0xff] }
  0xc4   :  { %307 = vmatpush.msra.mxu3 %v302_v53 }
  0xc5   :  { %v125_v56 = vmul.f32 %v124_v54, %v102_v41  ;;  %v127_v57 = vperm.slane %v124_v54, 0  ;;  %v150_v41 = vld [vmem:[#allocation6 + $0x6] sm:$0x1]  ;;  %v301_v54 = vld [vmem:[#allocation4 + $0x1f0] sm:$0xff] }
  0xc6   :  { %308 = vmatpush.msra.mxu3 %v301_v54 }
  0xc7   :  { %v126_v58 = vsub.f32 %v70_v55, %v125_v56  ;;  %v128_v59 = vmul.f32 %v127_v57, %v94_v21  ;;  %v212_v21 = vld [vmem:[#allocation4 + $0x110] sm:$0xff]  ;;  %v300_v55 = vld [vmem:[#allocation4 + $0x1e8] sm:$0xff]  ;;  %v299_v56 = vld [vmem:[#allocation4 + $0x1e0] sm:$0xff] }
  0xc8   :  { %243 = vmatpush.msra.mxu2 %v212_v21  ;;  %309 = vmatpush.msra.mxu3 %v300_v55  ;;  %v298_v57 = vld [vmem:[#allocation4 + $0x1d8] sm:$0xff] }
  0xc9   :  { %v129_v60 = vperm.slane %v126_v58, 0  ;;  %v297_v58 = vld [vmem:[#allocation4 + $0x1d0] sm:$0xff] }
  0xca   :  { %244 = vmatpush.msra.mxu2 %v211_v24  ;;  %310 = vmatpush.msra.mxu3 %v299_v56 }
  0xcb   :  { %v130_v61 = vadd.f32 %v129_v60, %v128_v59  ;;  %v296_v59 = vld [vmem:[#allocation4 + $0x1c8] sm:$0xff]  ;;  %v295_v60 = vld [vmem:[#allocation4 + $0x1c0] sm:$0xff] }
  0xcc   :  { %245 = vmatpush.msra.mxu2 %v210_v26  ;;  %311 = vmatpush.msra.mxu3 %v298_v57 }
  0xcd   :  { %v131_v62 = vmax.f32 %v130_v61, 0.0  ;;  %v406_v61 = vld [vmem:[#allocation6 + $0x2] ss:$0 sm:$0xff] }
  0xce   :  { %312 = vmatpush.msra.mxu3 %v297_v58 }
  0xcf   :  { %169 = vmatmul.f32.vlgmr.msra.gmra.mxu1 %v131_v62  ;;  %v294_v62 = vld [vmem:[#allocation4 + $0x1b8] sm:$0xff] }
  0xd0   :  { %313 = vmatpush.msra.mxu3 %v296_v59 }
  0xd2   :  { %314 = vmatpush.msra.mxu3 %v295_v60 }
  0xd4   :  { %315 = vmatpush.msra.mxu3 %v294_v62 }
  0xd6   :  { %316 = vmatpush.msra.mxu3 %v293_v63 }
  0xd8   :  { %317 = vmatpush.msra.mxu3 %v292_v2 }
  0xda   :  { %318 = vmatpush.msra.mxu3 %v291_v5  ;;  %v304_v5 = vld [vmem:[#allocation6 + $0x8] sm:$0x1] }
  0xdc   :  { %319 = vmatpush.msra.mxu3 %v290_v8 }
 0x14c   :  { %v170_v10 = vpop.f32.mrf.mxu1 }
 0x14d   :  { %v171_v11 = vadd.f32 %v405_v7, %v170_v10 }
 0x14f   :  { %v173_v13 = vrot.slane %v171_v11, 4  ;;  %v180_v14 = vmul.f32 %v171_v11, %v171_v11 }
 0x151   :  { %v174_v16 = vadd.f32 %v173_v13, %v171_v11  ;;  %v181_v17 = vrot.slane %v180_v14, 4 }
 0x153   :  { %v175_v19 = vrot.slane %v174_v16, 2  ;;  %v182_v20 = vadd.f32 %v181_v17, %v180_v14  ;;  %v288_v14 = vld [vmem:[#allocation4 + $0x188] sm:$0xff] }
 0x155   :  { %v176_v22 = vadd.f32 %v175_v19, %v174_v16  ;;  %v183_v23 = vrot.slane %v182_v20, 2  ;;  %v287_v16 = vld [vmem:[#allocation4 + $0x180] sm:$0xff] }
 0x157   :  { %v184_v25 = vadd.f32 %v183_v23, %v182_v20  ;;  %v177_v27 = vrot.slane %v176_v22, 1 }
 0x159   :  { %v185_v28 = vrot.slane %v184_v25, 1  ;;  %v178_v29 = vadd.f32 %v177_v27, %v176_v22 }
 0x15b   :  { %v186_v30 = vadd.f32 %v185_v28, %v184_v25  ;;  %v179_v31 = vmul.f32 0.125, %v178_v29 }
 0x15d   :  { %v187_v32 = vmul.f32 0.125, %v186_v30  ;;  %v188_v33 = vmul.f32 %v179_v31, %v179_v31 }
 0x15f   :  { %v189_v34 = vsub.f32 %v187_v32, %v188_v33 }
 0x161   :  { %v190_v35 = vadd.f32 1e-05, %v189_v34 }
 0x163   :  { %412 = vrsqrt.f32 %v190_v35  ;;  %vm197_vm5 = vweird.f32 %v190_v35 }
 0x169   :  { %v413_v36 = vpop.eup %412 }
 0x16a   :  { %v192_v37 = vmul.f32 %v413_v36, %v190_v35  ;;  %vm198_vm4 = vweird.f32 %v413_v36  ;;  %v228_v35 = vld [vmem:[#allocation6 + $0xb] sm:$0x1] }
 0x16b   :  { %vm199_vm6 = vmor %vm197_vm5, %vm198_vm4 }
 0x16c   :  { %v193_v38 = vmul.f32 %v413_v36, %v192_v37 }
 0x16e   :  { %v194_v39 = vmul.f32 0.5, %v193_v38 }
 0x170   :  { %v195_v40 = vsub.f32 1.5, %v194_v39 }
 0x172   :  { %v196_v42 = vmul.f32 %v413_v36, %v195_v40 }
 0x174   :  { %v200_v43 = vsel %vm199_vm6, %v413_v36, %v196_v42 }
 0x175   :  { %v201_v44 = vmul.f32 %v200_v43, %v150_v41  ;;  %v407_v43 = vld [vmem:[#allocation6 + $0x3] ss:$0 sm:$0xff] }
 0x177   :  { %v202_v46 = vmul.f32 %v201_v44, %v179_v31  ;;  %v204_v47 = vperm.slane %v201_v44, 0  ;;  %v227_v31 = vld [vmem:[#allocation6 + $0x7] sm:$0x1] }
 0x179   :  { %v203_v48 = vsub.f32 %v151_v45, %v202_v46  ;;  %v205_v49 = vmul.f32 %v204_v47, %v171_v11  ;;  %v289_v11 = vld [vmem:[#allocation4 + $0x190] sm:$0xff] }
 0x17a   :  { %320 = vmatpush.msra.mxu3 %v289_v11 }
 0x17b   :  { %v206_v50 = vperm.slane %v203_v48, 0 }
 0x17c   :  { %321 = vmatpush.msra.mxu3 %v288_v14 }
 0x17d   :  { %v207_v51 = vadd.f32 %v206_v50, %v205_v49 }
 0x17e   :  { %322 = vmatpush.msra.mxu3 %v287_v16  ;;  %v408_v16 = vld [vmem:[#allocation6 + $0xd] ss:$0 sm:$0xff] }
 0x17f   :  { %v208_v52 = vmax.f32 %v207_v51, 0.0 }
 0x181   :  { %246 = vmatmul.f32.vlgmr.msra.gmra.mxu2 %v208_v52 }
 0x204   :  { %v247_v0 = vpop.f32.mrf.mxu2 }
 0x205   :  { %v248_v1 = vadd.f32 %v406_v61, %v247_v0 }
 0x207   :  { %v250_v3 = vrot.slane %v248_v1, 4  ;;  %v257_v4 = vmul.f32 %v248_v1, %v248_v1 }
 0x209   :  { %v251_v6 = vadd.f32 %v250_v3, %v248_v1  ;;  %v258_v7 = vrot.slane %v257_v4, 4 }
 0x20b   :  { %v252_v9 = vrot.slane %v251_v6, 2  ;;  %v259_v10 = vadd.f32 %v258_v7, %v257_v4 }
 0x20d   :  { %v253_v12 = vadd.f32 %v252_v9, %v251_v6  ;;  %v260_v13 = vrot.slane %v259_v10, 2  ;;  %v305_v9 = vld [vmem:[#allocation6 + $0xc] sm:$0x1] }
 0x20f   :  { %v261_v15 = vadd.f32 %v260_v13, %v259_v10  ;;  %v254_v17 = vrot.slane %v253_v12, 1 }
 0x211   :  { %v262_v18 = vrot.slane %v261_v15, 1  ;;  %v255_v19 = vadd.f32 %v254_v17, %v253_v12 }
 0x213   :  { %v263_v20 = vadd.f32 %v262_v18, %v261_v15  ;;  %v256_v21 = vmul.f32 0.125, %v255_v19  ;;  %v409_v19 = vld [vmem:[#allocation6 + $0x4] ss:$0 sm:$0xff] }
 0x215   :  { %v264_v22 = vmul.f32 0.125, %v263_v20  ;;  %v265_v23 = vmul.f32 %v256_v21, %v256_v21 }
 0x217   :  { %v266_v24 = vsub.f32 %v264_v22, %v265_v23 }
 0x219   :  { %v267_v25 = vadd.f32 1e-05, %v266_v24 }
 0x21b   :  { %414 = vrsqrt.f32 %v267_v25  ;;  %vm274_vm8 = vweird.f32 %v267_v25 }
 0x221   :  { %v415_v26 = vpop.eup %414 }
 0x222   :  { %v269_v27 = vmul.f32 %v415_v26, %v267_v25  ;;  %vm275_vm7 = vweird.f32 %v415_v26 }
 0x223   :  { %vm276_vm9 = vmor %vm274_vm8, %vm275_vm7 }
 0x224   :  { %v270_v28 = vmul.f32 %v415_v26, %v269_v27 }
 0x226   :  { %v271_v29 = vmul.f32 0.5, %v270_v28 }
 0x228   :  { %v272_v30 = vsub.f32 1.5, %v271_v29 }
 0x22a   :  { %v273_v32 = vmul.f32 %v415_v26, %v272_v30 }
 0x22c   :  { %v277_v33 = vsel %vm276_vm9, %v415_v26, %v273_v32 }
 0x22d   :  { %v278_v34 = vmul.f32 %v277_v33, %v227_v31 }
 0x22f   :  { %v279_v36 = vmul.f32 %v278_v34, %v256_v21  ;;  %v281_v37 = vperm.slane %v278_v34, 0 }
 0x231   :  { %v280_v38 = vsub.f32 %v228_v35, %v279_v36  ;;  %v282_v39 = vmul.f32 %v281_v37, %v248_v1 }
 0x233   :  { %v283_v40 = vperm.slane %v280_v38, 0 }
 0x235   :  { %v284_v41 = vadd.f32 %v283_v40, %v282_v39 }
 0x237   :  { %v285_v42 = vmax.f32 %v284_v41, 0.0 }
 0x239   :  { %323 = vmatmul.f32.vlgmr.msra.gmra.mxu3 %v285_v42 }
 0x2bc   :  { %v324_v44 = vpop.f32.mrf.mxu3 }
 0x2bd   :  { %v325_v45 = vadd.f32 %v407_v43, %v324_v44 }
 0x2bf   :  { %v327_v46 = vrot.slane %v325_v45, 4  ;;  %v334_v47 = vmul.f32 %v325_v45, %v325_v45 }
 0x2c1   :  { %v328_v48 = vadd.f32 %v327_v46, %v325_v45  ;;  %v335_v49 = vrot.slane %v334_v47, 4 }
 0x2c3   :  { %v329_v50 = vrot.slane %v328_v48, 2  ;;  %v336_v51 = vadd.f32 %v335_v49, %v334_v47 }
 0x2c5   :  { %v330_v52 = vadd.f32 %v329_v50, %v328_v48  ;;  %v337_v53 = vrot.slane %v336_v51, 2 }
 0x2c7   :  { %v338_v54 = vadd.f32 %v337_v53, %v336_v51  ;;  %v331_v55 = vrot.slane %v330_v52, 1 }
 0x2c9   :  { %v339_v56 = vrot.slane %v338_v54, 1  ;;  %v332_v57 = vadd.f32 %v331_v55, %v330_v52 }
 0x2cb   :  { %v340_v58 = vadd.f32 %v339_v56, %v338_v54  ;;  %v333_v59 = vmul.f32 0.125, %v332_v57 }
 0x2cd   :  { %v341_v60 = vmul.f32 0.125, %v340_v58  ;;  %v342_v61 = vmul.f32 %v333_v59, %v333_v59 }
 0x2cf   :  { %v343_v62 = vsub.f32 %v341_v60, %v342_v61 }
 0x2d1   :  { %v344_v63 = vadd.f32 1e-05, %v343_v62 }
 0x2d3   :  { %416 = vrsqrt.f32 %v344_v63  ;;  %vm351_vm11 = vweird.f32 %v344_v63 }
 0x2d9   :  { %v417_v0 = vpop.eup %416 }
 0x2da   :  { %v346_v1 = vmul.f32 %v417_v0, %v344_v63  ;;  %vm352_vm10 = vweird.f32 %v417_v0 }
 0x2db   :  { %vm353_vm12 = vmor %vm351_vm11, %vm352_vm10 }
 0x2dc   :  { %v347_v2 = vmul.f32 %v417_v0, %v346_v1 }
 0x2de   :  { %v348_v3 = vmul.f32 0.5, %v347_v2 }
 0x2e0   :  { %v349_v4 = vsub.f32 1.5, %v348_v3 }
 0x2e2   :  { %v350_v6 = vmul.f32 %v417_v0, %v349_v4 }
 0x2e4   :  { %v354_v7 = vsel %vm353_vm12, %v417_v0, %v350_v6 }
 0x2e5   :  { %v355_v8 = vmul.f32 %v354_v7, %v304_v5 }
 0x2e7   :  { %v356_v10 = vmul.f32 %v355_v8, %v333_v59  ;;  %v358_v11 = vperm.slane %v355_v8, 0 }
 0x2e9   :  { %v357_v12 = vsub.f32 %v305_v9, %v356_v10  ;;  %v359_v13 = vmul.f32 %v358_v11, %v325_v45 }
 0x2eb   :  { %v360_v14 = vperm.slane %v357_v12, 0 }
 0x2ed   :  { %v361_v15 = vadd.f32 %v360_v14, %v359_v13 }
 0x2ef   :  { %v362_v17 = vmax.f32 %v361_v15, 0.0 }
 0x2f1   :  { %v366_v18 = vmul.f32 %v408_v16, %v362_v17 }
 0x2f3   :  { %367 = vadd.xlane.f32.xlu0 %v366_v18 }
 0x366   :  { %v368_v20 = vpop.xlane.xlu0 %367 }
 0x367   :  { %v370_v21 = vadd.f32 %v409_v19, %v368_v20 }
 0x369   :  { %v398_v22 = vmul.f32 -1.442695, %v370_v21 }
 0x36b   :  { %418 = vpow2.f32 %v398_v22 }
 0x371   :  { %v419_v23 = vpop.eup %418 }
 0x372   :  { %v374_v24 = vadd.f32 1.0, %v419_v23 }
 0x374   :  { %420 = vrcp.f32 %v374_v24  ;;  %v386_v28 = vand.u32 2147483648, %v374_v24  ;;  %v384_v30 = vand.u32 2147483647, %v374_v24  ;;  %vm380_vm14 = vweird.f32 %v374_v24 }
 0x376   :  { %v387_v32 = vor.u32 1.1754944e-38, %v386_v28  ;;  %vm385_vm0 = vcmp.eq.f32.partialorder %v384_v30, 8.507059e+37 }
 0x37a   :  { %v421_v25 = vpop.eup %420 }
 0x37b   :  { %v376_v26 = vmul.f32 %v421_v25, %v374_v24  ;;  %vm381_vm13 = vweird.f32 %v421_v25 }
 0x37c   :  { %vm382_vm15 = vmor %vm380_vm14, %vm381_vm13 }
 0x37d   :  { %v377_v27 = vsub.f32 1.0, %v376_v26 }
 0x37f   :  { %v378_v29 = vmul.f32 %v421_v25, %v377_v27 }
 0x381   :  { %v379_v31 = vadd.f32 %v421_v25, %v378_v29 }
 0x383   :  { %v383_v33 = vsel %vm382_vm15, %v421_v25, %v379_v31 }
 0x384   :  { %v388_v34 = vsel %vm385_vm0, %v387_v32, %v383_v33 }
 0x385   :  { %390 = vst [vmem:[%s538_s3] sm:$0xff] %v388_v34 }
 0x386   :  { %395 = vsyncpa [#allocation3], 1 }
 0x387   :  { %396 = vsyncpa [#allocation5], 1 }

</bundles_post_ra>
